<compile_context>
chip_gen: v7x
topology: tpu7x:2x2x1
jax: 0.10.0
libtpu: 0.0.40
codegen_flags: <defaults>
</compile_context>

<pallas_src>
import functools
from typing import NamedTuple

import jax
import jax.numpy as jnp
from jax.experimental import pallas as pl
from jax.experimental.pallas import tpu as pltpu

HIDDEN_LAYER_SIZE = 256
LANE = 128            # vreg/MXU lane width; fc2 output padded to this
LOGP_OFFSET = 64      # packed output: lanes [0,64)=probs, [64,128)=log_probs
NEG_INF = -1e30       # bias value for padded action lanes (softmax -> ~0)


def _round_up(x, m):
    return ((x + m - 1) // m) * m


class ActorParams(NamedTuple):
    """Preprocessed (padded / bf16-cast) actor parameters. Build once."""
    w1: jax.Array       # (state_dim, hidden)  bf16
    b1: jax.Array       # (1, hidden)          f32
    w2: jax.Array       # (hidden, LANE)       bf16, real action cols, rest 0
    b2: jax.Array       # (1, LANE)            f32, pad lanes = NEG_INF
    action_dim: int     # static python int


def prepare_actor_params(w1, b1, w2, b2):
    """One-time weight prep (hoisted off the per-call hot path)."""
    hidden = w1.shape[1]
    action_dim = w2.shape[1]
    assert action_dim <= LOGP_OFFSET, "packed layout assumes action_dim <= 64"
    w2p = jnp.zeros((hidden, LANE), jnp.float32).at[:, :action_dim].set(
        w2.astype(jnp.float32))
    b2p = jnp.full((1, LANE), NEG_INF, jnp.float32).at[:, :action_dim].set(
        jnp.reshape(b2, (1, action_dim)).astype(jnp.float32))
    return ActorParams(
        w1=w1.astype(jnp.bfloat16),
        b1=jnp.reshape(b1, (1, hidden)).astype(jnp.float32),
        w2=w2p.astype(jnp.bfloat16),
        b2=b2p,
        action_dim=int(action_dim),
    )


def _actor_kernel(x_ref, w1_ref, b1_ref, w2_ref, b2_ref, out_ref):
    # ---- fc1 + ReLU: bf16 MXU operands, f32 accumulate & elementwise ----
    h = jnp.dot(x_ref[...].astype(jnp.bfloat16), w1_ref[...],
                preferred_element_type=jnp.float32)
    h = jnp.maximum(h + b1_ref[...], 0.0)                      # (TB, H) f32

    # ---- fc2 (action dim padded to 128 lanes; padded biases = -1e30) ----
    logits = jnp.dot(h.astype(jnp.bfloat16), w2_ref[...],
                     preferred_element_type=jnp.float32)
    logits = logits + b2_ref[...]                              # (TB, 128) f32

    # ---- numerically-stable log-softmax; probs = exp(logp) (consistent) ----
    m = jnp.max(logits, axis=-1, keepdims=True)
    z = logits - m
    e = jnp.exp(z)
    logp = z - jnp.log(jnp.sum(e, axis=-1, keepdims=True))     # (TB, 128)
    probs = jnp.exp(logp)                                      # pad lanes ~0

    # ---- pack into a single lane-dense store:
    #        lanes [0, 64)  = probs       (pad lanes ~ 0)
    #        lanes [64,128) = log_probs   (pad lanes ~ -1e30)
    lane = jax.lax.broadcasted_iota(jnp.int32, logp.shape, 1)
    logp_hi = pltpu.roll(logp, shift=LOGP_OFFSET, axis=1)      # lane j -> j+64
    packed = jnp.where(lane < LOGP_OFFSET, probs, logp_hi)
    out_ref[...] = packed.astype(out_ref.dtype)


@functools.partial(jax.jit, static_argnames=("block_batch", "out_dtype"))
def _actor_forward_packed(state, w1, b1, w2, b2, *, block_batch=2048,
                          out_dtype=jnp.float32):
    batch, state_dim = state.shape
    hidden = w1.shape[1]

    # ---- batch tiling ----
    # Cap tile size (VMEM-safe even on v7x's 64 MiB), and split a single-tile
    # batch in two so the "parallel" grid can use both v7x TensorCores.
    rb = _round_up(batch, 8)
    tb = min(block_batch, rb)
    if tb == rb and rb >= 16:
        tb = _round_up((rb + 1) // 2, 8)
    padded_batch = _round_up(batch, tb)

    xp = state
    if padded_batch != batch:
        xp = jnp.zeros((padded_batch, state_dim), state.dtype).at[:batch].set(state)

    full = lambda i: (0, 0)      # weights/biases: VMEM-resident across steps
    tile = lambda i: (i, 0)      # activations: tiled along batch

    packed = pl.pallas_call(
        _actor_kernel,
        out_shape=jax.ShapeDtypeStruct((padded_batch, LANE), out_dtype),
        grid=(padded_batch // tb,),
        in_specs=[
            pl.BlockSpec((tb, state_dim), tile),
            pl.BlockSpec((state_dim, hidden), full),
            pl.BlockSpec((1, hidden), full),
            pl.BlockSpec((hidden, LANE), full),
            pl.BlockSpec((1, LANE), full),
        ],
        out_specs=pl.BlockSpec((tb, LANE), tile),
        compiler_params=pltpu.CompilerParams(
            dimension_semantics=("parallel",),
            vmem_limit_bytes=48 * 1024 * 1024,
        ),
    )(xp, w1, b1, w2, b2)
    return packed


def actor_forward_packed(state, params: ActorParams, *, block_batch=2048,
                         out_dtype=jnp.float32):
    """Hot-path entry point: returns the packed (padded_batch, 128) output.

    Lanes [0, 64) hold probs (pad lanes ~0); lanes [64, 128) hold log_probs
    (pad lanes ~ -1e30).  jax.random.categorical can consume the log_prob
    lanes directly without slicing.  Pass out_dtype=jnp.bfloat16 to halve
    writeback traffic when log_probs do not feed a high-precision loss.
    """
    return _actor_forward_packed(state, params.w1, params.b1, params.w2,
                                 params.b2, block_batch=block_batch,
                                 out_dtype=out_dtype)


def actor_forward(state, params: ActorParams, *, block_batch=2048,
                  out_dtype=jnp.float32):
    """Convenience wrapper: (probs, log_probs) sliced to (batch, action_dim).

    The slices cost an extra HBM round-trip; prefer actor_forward_packed on
    the hot path.
    """
    packed = actor_forward_packed(state, params, block_batch=block_batch,
                                  out_dtype=out_dtype)
    batch = state.shape[0]
    a = params.action_dim
    return packed[:batch, :a], packed[:batch, LOGP_OFFSET:LOGP_OFFSET + a]


def init_actor_params(key, state_dim, action_dim):
    """Deterministic init mimicking PyTorch nn.Linear default U[-1/sqrt(fan_in), +]."""
    k1, k2, k3, k4 = jax.random.split(key, 4)
    bound1 = 1.0 / jnp.sqrt(jnp.float32(state_dim))
    bound2 = 1.0 / jnp.sqrt(jnp.float32(HIDDEN_LAYER_SIZE))
    # stored as (in, out) = transpose of PyTorch's (out, in) weight layout
    w1 = jax.random.uniform(k1, (state_dim, HIDDEN_LAYER_SIZE), jnp.float32,
                            -bound1, bound1)
    b1 = jax.random.uniform(k2, (1, HIDDEN_LAYER_SIZE), jnp.float32,
                            -bound1, bound1)
    w2 = jax.random.uniform(k3, (HIDDEN_LAYER_SIZE, action_dim), jnp.float32,
                            -bound2, bound2)
    b2 = jax.random.uniform(k4, (1, action_dim), jnp.float32,
                            -bound2, bound2)
    return w1, b1, w2, b2


if __name__ == "__main__":
    key = jax.random.PRNGKey(0)
    batch = 10          # not a multiple of 8 -> exercises batch padding path
    state_dim = 16      # e.g. flattened Pensieve state
    action_dim = 6      # Pensieve bitrate levels

    k_params, k_state = jax.random.split(key)
    w1, b1, w2, b2 = init_actor_params(k_params, state_dim, action_dim)
    params = prepare_actor_params(w1, b1, w2, b2)   # one-time weight prep
    state = jax.random.normal(k_state, (batch, state_dim), jnp.float32)

    probs, log_probs = actor_forward(state, params)
    probs, log_probs = jax.block_until_ready((probs, log_probs))

    # sanity: shapes, nonnegative, rows sum to ~1, probs == exp(log_probs)
    assert probs.shape == (batch, action_dim)
    assert log_probs.shape == (batch, action_dim)
    assert bool(jnp.all(probs >= 0.0))
    assert bool(jnp.allclose(jnp.sum(probs, axis=-1), 1.0, atol=5e-3))
    assert bool(jnp.allclose(jnp.exp(log_probs), probs, atol=1e-5))

    # plain-JAX f32 reference (kernel uses bf16 MXU operands, so tolerance is
    # loosened accordingly)
    ref = jax.nn.softmax(jnp.maximum(state @ w1 + b1, 0.0) @ w2 + b2, axis=-1)
    assert bool(jnp.allclose(probs, ref, atol=2e-2))

    # TODO(synk): torch.distributions.Categorical object has no Pallas
    # equivalent; sample outside with jax.random.categorical on the packed
    # log_prob lanes (the -1e30 pad lanes are harmless).
    print("KERNEL_OK")
</pallas_src>

<mosaic_0001>
module attributes {stable_mosaic.version = 11 : i64} {
  func.func @_actor_kernel(%arg0: i32, %arg1: memref<8x16xf32, #tpu.memory_space<vmem>>, %arg2: memref<16x256xbf16, #tpu.memory_space<vmem>>, %arg3: memref<1x256xf32, #tpu.memory_space<vmem>>, %arg4: memref<256x128xbf16, #tpu.memory_space<vmem>>, %arg5: memref<1x128xf32, #tpu.memory_space<vmem>>, %arg6: memref<8x128xf32, #tpu.memory_space<vmem>>) attributes {dimension_semantics = [#tpu.dimension_semantics<parallel>], iteration_bounds = array<i64: 2>, scalar_prefetch = 0 : i64, scratch_operands = 0 : i64, tpu.core_type = #tpu.core_type<tc>, window_params = [{transform_indices = @transform_0, window_bounds = array<i64: 8, 16>}, {pipeline_mode = #tpu.pipeline_mode<synchronous>, transform_indices = @transform_1, window_bounds = array<i64: 16, 256>}, {pipeline_mode = #tpu.pipeline_mode<synchronous>, transform_indices = @transform_2, window_bounds = array<i64: 1, 256>}, {pipeline_mode = #tpu.pipeline_mode<synchronous>, transform_indices = @transform_3, window_bounds = array<i64: 256, 128>}, {pipeline_mode = #tpu.pipeline_mode<synchronous>, transform_indices = @transform_4, window_bounds = array<i64: 1, 128>}, {transform_indices = @transform_5, window_bounds = array<i64: 8, 128>}]} {
    %c0 = arith.constant 0 : index
    %c0_0 = arith.constant 0 : index
    %0 = vector.load %arg1[%c0, %c0_0] : memref<8x16xf32, #tpu.memory_space<vmem>>, vector<8x16xf32>
    %1 = arith.truncf %0 : vector<8x16xf32> to vector<8x16xbf16>
    %c0_1 = arith.constant 0 : index
    %c0_2 = arith.constant 0 : index
    %2 = vector.load %arg2[%c0_1, %c0_2] : memref<16x256xbf16, #tpu.memory_space<vmem>>, vector<16x256xbf16>
    %cst = arith.constant dense<0.000000e+00> : vector<8x256xf32>
    %3 = tpu.matmul %1, %2, %cst {dimension_numbers = #tpu.dot_dimension_numbers<[1], [0], [0], [1], [0, 0, 1, 1], [], []>} : vector<8x16xbf16>, vector<16x256xbf16>, vector<8x256xf32> -> vector<8x256xf32>
    %c0_3 = arith.constant 0 : index
    %c0_4 = arith.constant 0 : index
    %4 = vector.load %arg3[%c0_3, %c0_4] : memref<1x256xf32, #tpu.memory_space<vmem>>, vector<1x256xf32>
    %5 = vector.broadcast %4 : vector<1x256xf32> to vector<8x256xf32>
    %6 = arith.addf %3, %5 : vector<8x256xf32>
    %cst_5 = arith.constant 0.000000e+00 : f32
    %7 = vector.broadcast %cst_5 : f32 to vector<8x256xf32>
    %8 = arith.maximumf %6, %7 : vector<8x256xf32>
    %9 = arith.truncf %8 : vector<8x256xf32> to vector<8x256xbf16>
    %c0_6 = arith.constant 0 : index
    %c0_7 = arith.constant 0 : index
    %10 = vector.load %arg4[%c0_6, %c0_7] : memref<256x128xbf16, #tpu.memory_space<vmem>>, vector<256x128xbf16>
    %cst_8 = arith.constant dense<0.000000e+00> : vector<8x128xf32>
    %11 = tpu.matmul %9, %10, %cst_8 {dimension_numbers = #tpu.dot_dimension_numbers<[1], [0], [0], [1], [0, 0, 1, 1], [], []>} : vector<8x256xbf16>, vector<256x128xbf16>, vector<8x128xf32> -> vector<8x128xf32>
    %c0_9 = arith.constant 0 : index
    %c0_10 = arith.constant 0 : index
    %12 = vector.load %arg5[%c0_9, %c0_10] : memref<1x128xf32, #tpu.memory_space<vmem>>, vector<1x128xf32>
    %13 = vector.broadcast %12 : vector<1x128xf32> to vector<8x128xf32>
    %14 = arith.addf %11, %13 : vector<8x128xf32>
    %cst_11 = arith.constant dense<0xFF800000> : vector<8xf32>
    %15 = vector.multi_reduction <maximumf>, %14, %cst_11 [1] : vector<8x128xf32> to vector<8xf32>
    %16 = vector.shape_cast %15 : vector<8xf32> to vector<8x1xf32>
    %17 = vector.broadcast %16 : vector<8x1xf32> to vector<8x128xf32>
    %18 = arith.subf %14, %17 : vector<8x128xf32>
    %19 = math.exp %18 : vector<8x128xf32>
    %cst_12 = arith.constant dense<0.000000e+00> : vector<8xf32>
    %20 = vector.multi_reduction <add>, %19, %cst_12 [1] : vector<8x128xf32> to vector<8xf32>
    %21 = vector.shape_cast %20 : vector<8xf32> to vector<8x1xf32>
    %22 = math.log %21 : vector<8x1xf32>
    %23 = vector.broadcast %22 : vector<8x1xf32> to vector<8x128xf32>
    %24 = arith.subf %18, %23 : vector<8x128xf32>
    %25 = math.exp %24 : vector<8x128xf32>
    %26 = tpu.iota {dimensions = array<i32: 1>} : vector<8x128xi32>
    %c64_i32 = arith.constant 64 : i32
    %27 = tpu.dynamic_rotate %24 by %c64_i32 dim 1 : vector<8x128xf32>, i32 -> vector<8x128xf32>
    %c64_i32_13 = arith.constant 64 : i32
    %28 = vector.broadcast %c64_i32_13 : i32 to vector<8x128xi32>
    %29 = arith.cmpi slt, %26, %28 : vector<8x128xi32>
    %30 = arith.select %29, %25, %27 : vector<8x128xi1>, vector<8x128xf32>
    %c0_14 = arith.constant 0 : index
    %c0_15 = arith.constant 0 : index
    %31 = vector.load %arg6[%c0_14, %c0_15] : memref<8x128xf32, #tpu.memory_space<vmem>>, vector<8x128xf32>
    tpu.vector_store %arg6[%c0_14, %c0_15], %30 {strides = array<i32>} : memref<8x128xf32, #tpu.memory_space<vmem>>, vector<8x128xf32>,
    return
  }
  func.func @transform_0(%arg0: i32) -> (i32, i32) {
    %c0_i32 = arith.constant 0 : i32
    %c0_i32_0 = arith.constant 0 : i32
    return %arg0, %c0_i32 : i32, i32
  }
  func.func @transform_1(%arg0: i32) -> (i32, i32) {
    %c0_i32 = arith.constant 0 : i32
    %c0_i32_0 = arith.constant 0 : i32
    %c0_i32_1 = arith.constant 0 : i32
    return %c0_i32, %c0_i32_0 : i32, i32
  }
  func.func @transform_2(%arg0: i32) -> (i32, i32) {
    %c0_i32 = arith.constant 0 : i32
    %c0_i32_0 = arith.constant 0 : i32
    %c0_i32_1 = arith.constant 0 : i32
    return %c0_i32, %c0_i32_0 : i32, i32
  }
  func.func @transform_3(%arg0: i32) -> (i32, i32) {
    %c0_i32 = arith.constant 0 : i32
    %c0_i32_0 = arith.constant 0 : i32
    %c0_i32_1 = arith.constant 0 : i32
    return %c0_i32, %c0_i32_0 : i32, i32
  }
  func.func @transform_4(%arg0: i32) -> (i32, i32) {
    %c0_i32 = arith.constant 0 : i32
    %c0_i32_0 = arith.constant 0 : i32
    %c0_i32_1 = arith.constant 0 : i32
    return %c0_i32, %c0_i32_0 : i32, i32
  }
  func.func @transform_5(%arg0: i32) -> (i32, i32) {
    %c0_i32 = arith.constant 0 : i32
    %c0_i32_0 = arith.constant 0 : i32
    return %arg0, %c0_i32 : i32, i32
  }
}

</mosaic_0001>

<bundles_post_ra>
// kernel: _actor_forward_packed.1
= control target key start
LH: loop header
LB: loop body
LE: loop exit
PB: predicated region body
PF: predicated region fallthrough
CT: control target
= control target key end

     0   :  { %10 = vsyncpa [#allocation3], 0  ;;  %s1002_s0 = inlined_call_operand.vmem [shape: f32[16,16], index: 0, kind: input, shape index: {}]   ;;  %s1003_s1 = inlined_call_operand.vmem [shape: bf16[16,256], index: 1, kind: input, shape index: {}]   ;;  %s1004_s2 = inlined_call_operand.vmem [shape: f32[1,256], index: 2, kind: input, shape index: {}]   ;;  %s1005_s3 = inlined_call_operand.hbm [shape: bf16[256,128], index: 3, kind: input, shape index: {}]   ;;  %s1006_s4 = inlined_call_operand.vmem [shape: f32[1,128], index: 4, kind: input, shape index: {}]   ;;  %s1007_s5 = inlined_call_operand.hbm [shape: f32[16,128], index: 5, kind: output, shape index: {}]  }
   0x1   :  { %11 = vsyncpa [#allocation4], 0 }
   0x2   :  { %13 = vsyncpa [#allocation4 + $0x1], 0  ;;  %s855_s18 = smov 0   ;;  %s857_s19 = smov 0  }
   0x3   :  { %s859_s20 = smov 0   ;;  %s861_s21 = smov 0  }
   0x4 LB: > { %s876_s22 = sadd.s32 4294967295, %s817_s21   ;;  %s590_s23 = sadd.s32 4294967294, %s817_s21   ;;  %s817_s21 = sphi %s861_s21, %s1023_s21   ;;  %s813_s20 = sphi %s859_s20, %s1022_s20   ;;  %s809_s19 = sphi %s857_s19, %s1021_s19   ;;  %s805_s18 = sphi %s855_s18, %s1020_s18  }
   0x5   : > { %s880_s24 = sadd.s32 1, %s817_s21   ;;  %s136_s25 = sadd.s32 1, %s813_s20 }
   0x6   : > { %s133_s26 = ssub.s32 %s817_s21, %s880_s24  ;;  %p146_p0 = scmp.ne.s32.totalorder %s813_s20, %s809_s19 }
   0x7   : > { %p134_p1 = scmp.eq.s32.totalorder %s133_s26, 0  ;;  %p147_p2 = scmp.eq.s32.totalorder %s876_s22, 1 }
   0x8   : > { %p152_p3 = scmp.ne.s32.totalorder %s809_s19, %s805_s18  ;;  %p153_p4 = scmp.eq.s32.totalorder %s590_s23, 1 }
   0x9   : > { %s891_s27 = scalar_select %p134_p1, %s813_s20, %s136_s25  }
   0xa   : > { %p893_p5 = por %p147_p2, %p146_p0  ;;  %p897_p6 = por %p153_p4, %p152_p3 }
   0xb   : > { %p591_p7 = scmp.ge.s32.totalorder %s817_s21, 1  ;;  %p160_p8 = scmp.lt.s32.totalorder %s817_s21, 3 }
   0xc   : > { %s1011_s28 = scalar_select %p893_p5, 1, 0 }
   0xd   : > { %s1012_s29 = scalar_select %p897_p6, 1, 0 }
   0xe   : > { %p1008_p9 = scmp.eq.s32.totalorder %s876_s22, 0  ;;  %p904_p10 = pnand %p591_p7, %p160_p8 }
   0xf   : > { %s819_s6 = smov [#allocation2]   ;;  %s723_s11 = scalar_lea.hbm %s1005_s3, 2048 }
  0x10   : > { %s1013_s30 = scalar_select %p904_p10, 1, 0 }
  0x11   : > { %s178_s7 = sshll.u32 %s819_s6, 4  ;;  %p650_p11 = pneg %p904_p10  ;;  %s179_s7 = int_to_ptr.vmem [resolvable:$true] %s178_s7 }
  0x12   : > { %p724_p13 = scmp.ne.s32.totalorder %s1005_s3, %s723_s11  ;;  %p730_p3 = scmp.lt.u32.totalorder %s723_s11, %s1005_s3 }
  0x13   : > { %p912_p12 = pnand %p1008_p9, %p650_p11 }
  0x15   : > { %p725_p0 = pneg %p912_p12 }
  0x17   : > { %p726_p1 = pnand %p725_p0, %p724_p13 }
  0x19   : > { %p727_p2 = pneg %p726_p1 }
  0x1b   : > { %p732_p4 = pnand %p730_p3, %p727_p2 }
  0x1d   : > { %735 = shalt.err (!%p732_p4)
}
  0x1e   : > { %s736_s16 = scalar_lea.vmem %s179_s7, 2048  ;;  %p744_p9 = scmp.lt.s32.totalorder %s179_s7, %s179_s7 }
  0x1f   : > { %p737_p7 = scmp.ne.s32.totalorder %s179_s7, %s736_s16  ;;  %p745_p6 = scmp.lt.s32.totalorder %s736_s16, %s736_s16 }
  0x21   : > { %p739_p8 = pnand %p737_p7, %p725_p0  ;;  %p746_p5 = por %p745_p6, %p744_p9 }
  0x23   : > { %p740_p11 = pneg %p739_p8 }
  0x25   : > { %p747_p10 = pnand %p746_p5, %p740_p11 }
  0x27   : > { %750 = shalt.err (!%p747_p10)
}
  0x28   : > { %s820_s17 = smov 64   ;;  %s821_s23 = smov 4  }
  0x29   : > { %653 = dma.hbm_to_vmem [thread:$0]  (!%p912_p12), %s1005_s3, 2048, %s179_s7, [#allocation3], %s820_s17, %s820_s17, %s821_s23  }
  0x2a   : > { %p1015_p13 = scmp.ne.s32.totalorder %s1013_s30, 0 }
  0x2b   : > { %p1016_p1 = scmp.eq.s32.totalorder (!%p1015_p13), %s876_s22, 0 }
  0x2c   : > { %204 = sbr.rel (%p1015_p13) target bundleno = 942 (0x3ae), region = 40 }
  0x33   : > { %796 = dma.done.wait (%p1016_p1), [#allocation3], 2048   ;;  %p1017_p0 = pmov %p1016_p1 }
  0x34   : > { %p231_p5 = scmp.lt.s32.totalorder %s876_s22, 1  ;;  %v822_v0 = vmov 0   ;;  %v698_v1 = vld [vmem:[%s1003_s1 + $0x4] ss:$8 sps:$4 sm:$0xff]   ;;  %v700_v2 = vld [vmem:[%s1003_s1] ss:$8 sps:$4 sm:$0xff]   ;;  %v242_v21 = vlaneseq }
  0x35   : > { %798 = vsyncadd (%p1017_p0), [#allocation3], 4294965248  ;;  %298 = vmatprep.mubr.bf16.mxu0 %v822_v0  ;;  %266 = vmatprep.subr.bf16.mxu0 %v698_v1  ;;  %v701_v5 = vld [vmem:[#allocation2 + $0x40] sm:$0xff]   ;;  %vm262_vm0 = vcmask 130048   ;;  %v703_v7 = vld [vmem:[#allocation2 + $0x48] sm:$0xff]   ;;  %s823_s23 = smov 64  }
  0x36   : > { %s232_s6 = scalar_select %p231_p5, %s876_s22, 1  ;;  %267 = vmatpush1.bf16.msra.mxu0 %v700_v2  ;;  %v702_v6 = vld [vmem:[#allocation2] sm:$0xff]   ;;  %622 = vmatprep.subr.bf16.mxu1 %v701_v5  ;;  %v704_v8 = vld [vmem:[#allocation2 + $0x8] sm:$0xff]   ;;  %v705_v9 = vld [vmem:[#allocation2 + $0x50] sm:$0xff]   ;;  %v243_v22 = vshrl.u32 %v242_v21, 7  ;;  %v499_v54 = vand.u32 127, %v242_v21 }
  0x37   : > { %623 = vmatpush3.bf16.msra.mxu1 %v702_v6  ;;  %v706_v10 = vld [vmem:[#allocation2 + $0x10] sm:$0xff]   ;;  %v707_v11 = vld [vmem:[#allocation2 + $0x58] sm:$0xff]   ;;  %v709_v13 = vld [vmem:[#allocation2 + $0x60] sm:$0xff]   ;;  %s228_s25 = sand.u32 1, %s809_s19   ;;  %p1018_p9 = scmp.ne.s32.totalorder %s1011_s28, 0 }
  0x38   : > { %s597_s8 = sshll.u32 %s232_s6, 3  ;;  %624 = vmatprep.subr.bf16.mxu1 %v703_v7  ;;  %v708_v12 = vld [vmem:[#allocation2 + $0x18] sm:$0xff]   ;;  %v710_v14 = vld [vmem:[#allocation2 + $0x20] sm:$0xff]   ;;  %v711_v15 = vld [vmem:[#allocation2 + $0x68] sm:$0xff]   ;;  %v244_v23 = vsub.s32 0, %v243_v22  ;;  %v248_v25 = vsub.s32 1, %v243_v22 }
  0x39   : > { %s234_s7 = scalar_lea.vmem %s1002_s0, %s597_s8  ;;  %v712_v16 = vld [vmem:[#allocation2 + $0x28] sm:$0xff]   ;;  %v713_v17 = vld [vmem:[#allocation2 + $0x70] sm:$0xff]   ;;  %v715_v19 = vld [vmem:[#allocation2 + $0x78] sm:$0xff]   ;;  %s596_s26 = sshll.u32 %s228_s25, 3  ;;  %vm502_vm1 = vcmp.lt.s32.totalorder %v499_v54, 64 }
  0x3a   : > { %v236_v3 = vld [vmem:[%s234_s7] sm:$0xff]  ;;  %v714_v18 = vld [vmem:[#allocation2 + $0x30] sm:$0xff]   ;;  %v716_v20 = vld [vmem:[#allocation2 + $0x38] sm:$0xff]   ;;  %s619_s6 = sshll.u32 %s876_s22, 7  ;;  %s230_s8 = scalar_lea.vmem [#allocation5], %s596_s26 }
  0x3b   : > { %v237_v4 = vpack.c.bf16 %v236_v3, %v236_v3  ;;  %625 = vmatpush3.bf16.msra.mxu1 %v704_v8  ;;  %v240_v24 = vld [vmem:[%s1004_s2] sm:$0x3]  ;;  %s519_s9 = sshll.u32 %s230_s8, 4  ;;  %s960_s11 = scalar_lea.hbm %s1007_s5, %s619_s6  ;;  %s962_s9 = int_to_ptr.vmem [resolvable:$true] %s519_s9 }
  0x3c   : > { %626 = vmatprep.subr.bf16.mxu1 %v705_v9  ;;  %v245_v26 = vrot.slane %v240_v24, %v244_v23  ;;  %v249_v27 = vrot.slane %v240_v24, %v248_v25  ;;  %v601_v40 = vld [vmem:[%s1006_s4] ss:$0 sm:$0xff]  ;;  %s506_s30 = scalar_lea.sflag [#allocation4], %s228_s25  ;;  %s751_s12 = scalar_lea.vmem %s962_s9, 128 }
  0x3d   : > { %600 = vmatmul.mubr.msk.bf16.vlgmr.msra.gmra.mrb[0].mxu0 %vm262_vm0, %v237_v4  ;;  %p752_p6 = scmp.ne.s32.totalorder %s962_s9, %s751_s12  ;;  %s824_s22 = smov [#allocation5]  }
  0x3e   : > { %s755_s13 = sshll.u32 %s824_s22, 4  ;;  %s756_s13 = int_to_ptr.vmem [resolvable:$false] %s755_s13 }
  0x3f   : > { %627 = vmatpush3.bf16.msra.mxu1 %v706_v10  ;;  %p753_p10 = pnand %p752_p6, %p1018_p9  ;;  %s757_s14 = scalar_lea.vmem %s756_s13, 256 }
  0x40   : > { %628 = vmatprep.subr.bf16.mxu1 %v707_v11  ;;  %p758_p2 = scmp.lt.s32.totalorder %s962_s9, %s756_s13  ;;  %p759_p3 = scmp.lt.s32.totalorder %s757_s14, %s751_s12 }
  0x41   : > { %p754_p12 = pneg %p753_p10 }
  0x42   : > { %p760_p4 = por %p759_p3, %p758_p2 }
  0x43   : > { %629 = vmatpush3.bf16.msra.mxu1 %v708_v12 }
  0x44   : > { %630 = vmatprep.subr.bf16.mxu1 %v709_v13  ;;  %p761_p7 = pnand %p760_p4, %p754_p12 }
  0x47   : > { %631 = vmatpush3.bf16.msra.mxu1 %v710_v14 }
  0x48   : > { %632 = vmatprep.subr.bf16.mxu1 %v711_v15 }
  0x4b   : > { %633 = vmatpush3.bf16.msra.mxu1 %v712_v16 }
  0x4c   : > { %634 = vmatprep.subr.bf16.mxu1 %v713_v17 }
  0x4f   : > { %635 = vmatpush3.bf16.msra.mxu1 %v714_v18 }
  0x50   : > { %636 = vmatprep.subr.bf16.mxu1 %v715_v19 }
  0x53   : > { %637 = vmatpush3.bf16.msra.mxu1 %v716_v20 }
 0x110   : > { %v300_v28 = vpop.f32.mrb[0].mxu0 }
 0x111   : > { %v301_v29 = vadd.f32 %v300_v28, %v245_v26  ;;  %v302_v30 = vpop.f32.mrb[1].mxu0 }
 0x112   : > { %v303_v31 = vadd.f32 %v302_v30, %v249_v27  ;;  %v304_v32 = vpop.f32.mrb[2].mxu0 }
 0x113   : > { %v307_v33 = vmax.f32 %v301_v29, 0.0  ;;  %v305_v34 = vpop.f32.mrb[3].mxu0 }
 0x114   : > { %v308_v35 = vmax.f32 %v303_v31, 0.0 }
 0x115   : > { %v309_v37 = vpack.c.bf16 %v307_v33, %v307_v33 }
 0x116   : > { %v310_v36 = vpack.c.bf16 %v308_v35, %v308_v35 }
 0x118   : > { %478 = vmatprep.mubr.bf16.mxu1 %v310_v36 }
 0x119   : > { %479 = vmatmul.mubr.bf16.vlgmr.msra.gmra.mrb[0].mxu1 %v309_v37 }
 0x1ec   : > { %v638_v38 = vpop.f32.mrb[0].mxu1 }
 0x1ed   : > { %v639_v39 = vpop.f32.mrb[1].mxu1 }
 0x1ee   : > { %v640_v41 = vadd.f32 %v639_v39, %v638_v38  ;;  %v641_v42 = vpop.f32.mrb[2].mxu1 }
 0x1ef   : > { %v642_v43 = vpop.f32.mrb[3].mxu1 }
 0x1f0   : > { %v481_v44 = vadd.f32 %v640_v41, %v601_v40 }
 0x1f2   : > { %486 = vmax.xlane.f32.xlu0 %v481_v44 }
 0x27f   : > { %v487_v45 = vpop.xlane.xlu0 %486 }
 0x280   : > { %v488_v46 = vsub.f32 %v481_v44, %v487_v45 }
 0x282   : > { %v489_v47 = vmul.f32 1.442695, %v488_v46 }
 0x284   : > { %717 = vpow2.f32 %v489_v47 }
 0x28e   : > { %v718_v48 = vpop.eup %717 }
 0x28f   : > { %491 = vadd.xlane.f32.xlu0 %v718_v48 }
 0x31c   : > { %v492_v49 = vpop.xlane.xlu0 %491 }
 0x31d   : > { %719 = vlog2.f32 %v492_v49 }
 0x327   : > { %v720_v50 = vpop.eup %719 }
 0x328   : > { %v494_v51 = vmul.f32 0.6931472, %v720_v50 }
 0x32a   : > { %v495_v52 = vsub.f32 %v488_v46, %v494_v51 }
 0x32c   : > { %500 = vrot.lane.b32.xlu1 %v495_v52, %s823_s23  ;;  %v496_v53 = vmul.f32 1.442695, %v495_v52 }
 0x32e   : > { %721 = vpow2.f32 %v496_v53 }
 0x338   : > { %v722_v55 = vpop.eup %721 }
 0x39e   : > { %v501_v56 = vpop.permute.xlu1 %500 }
 0x39f   : > { %v503_v57 = vsel %vm502_vm1, %v722_v55, %v501_v56 }
 0x3a0   : > { %504 = vst [vmem:[%s230_s8] sm:$0xff] %v503_v57 }
 0x3a1   : > { %764 = shalt.err (!%p761_p7)
}
 0x3a2   : > { %s765_s15 = scalar_lea.hbm %s960_s11, 128  ;;  %s769_s23 = scalar_lea.hbm %s1007_s5, 256 }
 0x3a3   : > { %p766_p8 = scmp.ne.s32.totalorder %s960_s11, %s765_s15  ;;  %p770_p1 = scmp.lt.u32.totalorder %s960_s11, %s1007_s5 }
 0x3a4   : > { %p771_p0 = scmp.lt.u32.totalorder %s769_s23, %s765_s15  ;;  %p773_p6 = scmp.lt.u32.totalorder %s765_s15, %s960_s11 }
 0x3a5   : > { %p767_p11 = pnand %p766_p8, %p1018_p9 }
 0x3a6   : > { %p772_p5 = por %p771_p0, %p770_p1 }
 0x3a7   : > { %p768_p13 = pneg %p767_p11 }
 0x3a8   : > { %p774_p10 = por %p773_p6, %p772_p5 }
 0x3aa   : > { %p775_p12 = pnand %p774_p10, %p768_p13 }
 0x3ac   : > { %778 = shalt.err (!%p775_p12)
}
 0x3ad   : > { %648 = dma.vmem_to_hbm [thread:$0]  (%p1018_p9), %s962_s9, 128, %s960_s11, %s506_s30  }
 0x3ae PF: > { %p660_p2 = scmp.ge.s32.totalorder %s817_s21, 2  ;;  %s531_s6 = sand.u32 1, %s805_s18  }
 0x3af   : > { %p1019_p3 = scmp.ne.s32.totalorder %s1012_s29, 0  ;;  %s532_s8 = scalar_lea.sflag [#allocation4], %s531_s6 }
 0x3b1   : > { %p655_p4 = pnand %p660_p2, %p1019_p3 }
 0x3b3   : > { %800 = dma.done.wait (!%p655_p4), %s532_s8, 128  }
 0x3b4   : > { %802 = vsyncadd (!%p655_p4), %s532_s8, 4294967168  ;;  %p16_p7 = scmp.ge.s32.totalorder %s880_s24, 4   ;;  %s1020_s18 = smov %s809_s19 }
 0x3b5   : > { %s1021_s19 = smov %s813_s20  ;;  %s1022_s20 = smov %s891_s27 }
 0x3b6   : > { %s1023_s21 = smov %s880_s24  ;;  %18 = sbr.rel (!%p16_p7) target bundleno = 4 (0x4), region = 80 }
 0x3bd   :  { %537 = vsyncpa [#allocation3], 1 }
 0x3be   :  { %539 = vsyncpa [#allocation3 + $0x1], 1 }
 0x3bf   :  { %540 = vsyncpa [#allocation4], 1 }
 0x3c0   :  { %542 = vsyncpa [#allocation4 + $0x1], 1 }

</bundles_post_ra>
